<compile_context>
chip_gen: v7x
topology: tpu7x:2x2x1
jax: 0.10.0
libtpu: 0.0.40
codegen_flags: <defaults>
</compile_context>

<pallas_src>
import jax
import jax.numpy as jnp
from jax.experimental import pallas as pl
from jax.experimental.pallas import tpu as pltpu


def _gelu_tanh(x):
    # Exact reproduction of the reference GELU:
    # 0.5 * x * (1 + tanh(sqrt(2/pi) * (x + 0.044715 * x**3)))
    c = jnp.sqrt(jnp.asarray(2.0 / jnp.pi, dtype=x.dtype))
    return 0.5 * x * (1.0 + jnp.tanh(c * (x + 0.044715 * (x ** 3))))


def _ffn_kernel_f32out(x_ref, w1_ref, b1_ref, w2_ref, b2_ref, o_ref):
    # x:[TM,Dp] (mxu dtype)  w1:[Dp,TH]  b1:[1,TH] f32  w2:[TH,Dp]  b2:[1,Dp] f32
    # o:[TM,Dp] f32 -- resident across the hidden axis, used as the accumulator.
    hi = pl.program_id(1)

    h = jnp.dot(x_ref[...], w1_ref[...], preferred_element_type=jnp.float32)
    h = h + b1_ref[...].astype(jnp.float32)
    g = _gelu_tanh(h)                                   # f32: tanh->EUP, poly->VPU
    contrib = jnp.dot(g.astype(w2_ref.dtype), w2_ref[...],
                      preferred_element_type=jnp.float32)

    @pl.when(hi == 0)
    def _():
        o_ref[...] = contrib

    @pl.when(hi > 0)
    def _():
        o_ref[...] += contrib

    @pl.when(hi == pl.num_programs(1) - 1)
    def _():
        o_ref[...] += b2_ref[...].astype(jnp.float32)


def _ffn_kernel_acc(x_ref, w1_ref, b1_ref, w2_ref, b2_ref, o_ref, acc_ref):
    # Variant for non-f32 output dtypes: f32 VMEM accumulator scratch.
    hi = pl.program_id(1)

    @pl.when(hi == 0)
    def _():
        acc_ref[...] = jnp.zeros_like(acc_ref)

    h = jnp.dot(x_ref[...], w1_ref[...], preferred_element_type=jnp.float32)
    h = h + b1_ref[...].astype(jnp.float32)
    g = _gelu_tanh(h)
    acc_ref[...] += jnp.dot(g.astype(w2_ref.dtype), w2_ref[...],
                            preferred_element_type=jnp.float32)

    @pl.when(hi == pl.num_programs(1) - 1)
    def _():
        o_ref[...] = (acc_ref[...] + b2_ref[...].astype(jnp.float32)).astype(o_ref.dtype)


def _round_up(x, m):
    return ((x + m - 1) // m) * m


def _tpu_limits():
    """(vmem_capacity_bytes, tensorcores_per_chip) with conservative fallbacks."""
    cap, cores = None, None
    try:
        info = pltpu.get_tpu_info()
        cap = getattr(info, "vmem_capacity_bytes", None)
        for name in ("num_cores", "core_count", "num_tensorcores"):
            cores = getattr(info, name, None)
            if cores:
                break
    except Exception:
        pass
    if not cap:
        cap = 64 * 1024 * 1024          # v7x per-TensorCore VMEM (safe everywhere)
    if not cores:
        cores = 2 if cap <= 64 * 1024 * 1024 else 1
    return int(cap), int(cores)


def feed_forward(x, w1, b1, w2, b2, *, tm=512, th=512, mxu_dtype=jnp.bfloat16):
    """x: [..., emb_dim]. Weights stored [in, out] (= torch weight.T).

    mxu_dtype: dtype for the matmul operands (default bf16 -> native MXU path
    on v5e/v6e/v7x); bias add, GELU and accumulation stay float32.  Pass None
    for a fully-f32 (exact) path.
    """
    emb_dim = x.shape[-1]
    hidden = w1.shape[1]
    lead = x.shape[:-1]
    x2d = x.reshape(-1, emb_dim)
    n_tok = x2d.shape[0]

    f32_out = jnp.dtype(x.dtype) == jnp.dtype(jnp.float32)
    x_itemsize = jnp.dtype(mxu_dtype or x.dtype).itemsize
    w_itemsize = jnp.dtype(mxu_dtype or w1.dtype).itemsize
    o_itemsize = jnp.dtype(x.dtype).itemsize

    # ---- lane/sublane-friendly padding & tile selection ---------------------
    # (128-lane rounding; rounding to 256 only matters for odd dims on the
    #  256-wide MXUs of v6e/v7x and costs extra padding on v5e.)
    d_p = _round_up(emb_dim, 128)
    h_p0 = _round_up(hidden, 128)
    th = min(th, h_p0)
    tm = max(8, min(tm, _round_up(n_tok, 8)))

    vmem_cap, n_cores = _tpu_limits()

    # Megacore (v7x): the hidden axis is a reduction, so only the token axis can
    # be core-sharded -- make sure it has at least one tile per TensorCore.
    if n_cores > 1 and n_tok > 8:
        per_core = _round_up(-(-n_tok // n_cores), 8)
        tm = min(tm, max(8, per_core))

    def _vmem_est(tm_, th_):
        return (2 * tm_ * d_p * x_itemsize        # double-buffered x tiles
                + 2 * d_p * th_ * w_itemsize      # double-buffered w1 slabs
                + 2 * th_ * d_p * w_itemsize      # double-buffered w2 slabs
                + 2 * (th_ + d_p) * 4             # biases (f32)
                + 2 * tm_ * d_p * o_itemsize      # output tiles
                + (0 if f32_out else tm_ * d_p * 4)  # acc scratch (non-f32 out only)
                + tm_ * th_ * 4)                  # live hidden activation (f32)

    headroom = 12 * 1024 * 1024
    budget = max(24 * 1024 * 1024, vmem_cap - headroom)
    # Shrink the working set until it fits this chip's VMEM (keeps double
    # buffering instead of single-buffered DMA stalls / compile failure).
    while _vmem_est(tm, th) * 5 // 4 > budget:
        if th > 256:
            th = max(256, _round_up(th // 2, 128))
        elif tm > 128:
            tm = max(128, _round_up(tm // 2, 8))
        elif th > 128:
            th = 128
        elif tm > 8:
            tm = max(8, _round_up(tm // 2, 8))
        else:
            break

    t_p = _round_up(n_tok, tm)
    h_p = _round_up(h_p0, th)

    # ---- pad (zero contributions for padded rows/cols; GELU(0)=0) -----------
    xp = jnp.pad(x2d, ((0, t_p - n_tok), (0, d_p - emb_dim)))
    w1p = jnp.pad(w1, ((0, d_p - emb_dim), (0, h_p - hidden)))
    b1p = jnp.pad(b1, (0, h_p - hidden)).reshape(1, h_p).astype(jnp.float32)
    w2p = jnp.pad(w2, ((0, h_p - hidden), (0, d_p - emb_dim)))
    b2p = jnp.pad(b2, (0, d_p - emb_dim)).reshape(1, d_p).astype(jnp.float32)
    if mxu_dtype is not None:
        xp = xp.astype(mxu_dtype)      # cast once here, not per hidden step in-kernel
        w1p = w1p.astype(mxu_dtype)
        w2p = w2p.astype(mxu_dtype)
    # TODO(synk): optional v7x follow-up: fp8 weights + per-channel scales folded
    # into the epilogue for another ~2x MXU/DMA win.

    grid = (t_p // tm, h_p // th)
    n_token_tiles = grid[0]

    vmem_limit = int(min(max(_vmem_est(tm, th) * 5 // 4, 32 * 1024 * 1024),
                         vmem_cap - headroom))

    # Honest advisory cost: weights are re-streamed once per token tile.
    cost = pl.CostEstimate(
        flops=2 * 2 * t_p * d_p * h_p,
        transcendentals=t_p * h_p,
        bytes_accessed=(xp.size * x_itemsize
                        + t_p * d_p * o_itemsize
                        + n_token_tiles * (w1p.size + w2p.size) * w_itemsize
                        + n_token_tiles * (b1p.size + b2p.size) * 4),
    )

    if f32_out:
        kernel = _ffn_kernel_f32out
        scratch_shapes = []
    else:
        kernel = _ffn_kernel_acc
        scratch_shapes = [pltpu.VMEM((tm, d_p), jnp.float32)]

    out_p = pl.pallas_call(
        kernel,
        out_shape=jax.ShapeDtypeStruct((t_p, d_p), x.dtype),
        grid_spec=pltpu.PrefetchScalarGridSpec(
            num_scalar_prefetch=0,
            grid=grid,
            in_specs=[
                pl.BlockSpec((tm, d_p), lambda i, h: (i, 0)),   # x tile
                pl.BlockSpec((d_p, th), lambda i, h: (0, h)),   # w1 slab
                pl.BlockSpec((1, th), lambda i, h: (0, h)),     # b1 slab
                pl.BlockSpec((th, d_p), lambda i, h: (h, 0)),   # w2 slab
                pl.BlockSpec((1, d_p), lambda i, h: (0, 0)),    # b2 (resident)
            ],
            out_specs=pl.BlockSpec((tm, d_p), lambda i, h: (i, 0)),
            scratch_shapes=scratch_shapes,
        ),
        compiler_params=pltpu.CompilerParams(
            dimension_semantics=("parallel", "arbitrary"),
            vmem_limit_bytes=vmem_limit,
        ),
        cost_estimate=cost,
    )(xp, w1p, b1p, w2p, b2p)

    return out_p[:n_tok, :emb_dim].reshape(*lead, emb_dim)


def init_params(key, emb_dim):
    """Deterministic init matching the nn.Linear shapes in FeedForward.__init__."""
    hidden = 4 * emb_dim
    k1, k2, k3, k4 = jax.random.split(key, 4)
    lim1 = 1.0 / jnp.sqrt(emb_dim)
    lim2 = 1.0 / jnp.sqrt(hidden)
    # Stored as [in, out] (= torch weight.T) for row-major matmul in the kernel.
    w1 = jax.random.uniform(k1, (emb_dim, hidden), jnp.float32, -lim1, lim1)
    b1 = jax.random.uniform(k2, (hidden,), jnp.float32, -lim1, lim1)
    w2 = jax.random.uniform(k3, (hidden, emb_dim), jnp.float32, -lim2, lim2)
    b2 = jax.random.uniform(k4, (emb_dim,), jnp.float32, -lim2, lim2)
    return w1, b1, w2, b2


def _ref_feed_forward(x, w1, b1, w2, b2):
    h = x @ w1 + b1
    g = _gelu_tanh(h)
    return g @ w2 + b2


if __name__ == "__main__":
    key = jax.random.PRNGKey(0)

    # Config 1: the cfg['emb_dim']=32 toy case from the module spec.
    # Config 2: odd sizes to exercise lane/sublane/hidden padding + tile split.
    for (batch, seq, emb_dim) in [(2, 8, 32), (3, 13, 40)]:
        kx, kp, key = jax.random.split(key, 3)
        x = jax.random.normal(kx, (batch, seq, emb_dim), jnp.float32)
        w1, b1, w2, b2 = init_params(kp, emb_dim)
        ref = _ref_feed_forward(x, w1, b1, w2, b2)

        # Exact f32 operand path (tight check).
        out_f32 = jax.block_until_ready(
            feed_forward(x, w1, b1, w2, b2, mxu_dtype=None))
        assert out_f32.shape == x.shape and out_f32.dtype == x.dtype
        assert jnp.allclose(out_f32, ref, atol=1e-5, rtol=1e-5), (
            f"f32 mismatch emb_dim={emb_dim}: "
            f"max err {jnp.max(jnp.abs(out_f32 - ref))}")

        # Default bf16-operand path (f32 accumulation) -- looser tolerance for
        # the expected bf16 operand rounding.
        out_bf16 = jax.block_until_ready(feed_forward(x, w1, b1, w2, b2))
        assert out_bf16.shape == x.shape and out_bf16.dtype == x.dtype
        assert jnp.allclose(out_bf16, ref, atol=6e-2, rtol=6e-2), (
            f"bf16 mismatch emb_dim={emb_dim}: "
            f"max err {jnp.max(jnp.abs(out_bf16 - ref))}")

    print("KERNEL_OK")
</pallas_src>

<mosaic_0001>
module attributes {stable_mosaic.version = 11 : i64} {
  func.func @_ffn_kernel_f32out(%arg0: i32, %arg1: i32, %arg2: memref<8x128xf32, #tpu.memory_space<vmem>>, %arg3: memref<128x128xf32, #tpu.memory_space<vmem>>, %arg4: memref<1x128xf32, #tpu.memory_space<vmem>>, %arg5: memref<128x128xf32, #tpu.memory_space<vmem>>, %arg6: memref<1x128xf32, #tpu.memory_space<vmem>>, %arg7: memref<8x128xf32, #tpu.memory_space<vmem>>) attributes {dimension_semantics = [#tpu.dimension_semantics<parallel>, #tpu.dimension_semantics<arbitrary>], iteration_bounds = array<i64: 2, 1>, scalar_prefetch = 0 : i64, scratch_operands = 0 : i64, tpu.core_type = #tpu.core_type<tc>, window_params = [{transform_indices = @transform_0, window_bounds = array<i64: 8, 128>}, {transform_indices = @transform_1, window_bounds = array<i64: 128, 128>}, {transform_indices = @transform_2, window_bounds = array<i64: 1, 128>}, {transform_indices = @transform_3, window_bounds = array<i64: 128, 128>}, {pipeline_mode = #tpu.pipeline_mode<synchronous>, transform_indices = @transform_4, window_bounds = array<i64: 1, 128>}, {transform_indices = @transform_5, window_bounds = array<i64: 8, 128>}]} {
    %c0 = arith.constant 0 : index
    %c0_0 = arith.constant 0 : index
    %0 = vector.load %arg2[%c0, %c0_0] : memref<8x128xf32, #tpu.memory_space<vmem>>, vector<8x128xf32>
    %c0_1 = arith.constant 0 : index
    %c0_2 = arith.constant 0 : index
    %1 = vector.load %arg3[%c0_1, %c0_2] : memref<128x128xf32, #tpu.memory_space<vmem>>, vector<128x128xf32>
    %cst = arith.constant dense<0.000000e+00> : vector<8x128xf32>
    %2 = tpu.matmul %0, %1, %cst {dimension_numbers = #tpu.dot_dimension_numbers<[1], [0], [0], [1], [0, 0, 1, 1], [], []>} : vector<8x128xf32>, vector<128x128xf32>, vector<8x128xf32> -> vector<8x128xf32>
    %c0_3 = arith.constant 0 : index
    %c0_4 = arith.constant 0 : index
    %3 = vector.load %arg4[%c0_3, %c0_4] : memref<1x128xf32, #tpu.memory_space<vmem>>, vector<1x128xf32>
    %4 = vector.broadcast %3 : vector<1x128xf32> to vector<8x128xf32>
    %5 = arith.addf %2, %4 : vector<8x128xf32>
    %cst_5 = arith.constant 0.636619746 : f32
    %6 = math.sqrt %cst_5 : f32
    %cst_6 = arith.constant 5.000000e-01 : f32
    %7 = vector.broadcast %cst_6 : f32 to vector<8x128xf32>
    %8 = arith.mulf %7, %5 : vector<8x128xf32>
    %9 = arith.mulf %5, %5 : vector<8x128xf32>
    %10 = arith.mulf %5, %9 : vector<8x128xf32>
    %cst_7 = arith.constant 4.471500e-02 : f32
    %11 = vector.broadcast %cst_7 : f32 to vector<8x128xf32>
    %12 = arith.mulf %11, %10 : vector<8x128xf32>
    %13 = arith.addf %5, %12 : vector<8x128xf32>
    %14 = vector.broadcast %6 : f32 to vector<8x128xf32>
    %15 = arith.mulf %14, %13 : vector<8x128xf32>
    %16 = math.tanh %15 : vector<8x128xf32>
    %cst_8 = arith.constant 1.000000e+00 : f32
    %17 = vector.broadcast %cst_8 : f32 to vector<8x128xf32>
    %18 = arith.addf %17, %16 : vector<8x128xf32>
    %19 = arith.mulf %8, %18 : vector<8x128xf32>
    %c0_9 = arith.constant 0 : index
    %c0_10 = arith.constant 0 : index
    %20 = vector.load %arg5[%c0_9, %c0_10] : memref<128x128xf32, #tpu.memory_space<vmem>>, vector<128x128xf32>
    %cst_11 = arith.constant dense<0.000000e+00> : vector<8x128xf32>
    %21 = tpu.matmul %19, %20, %cst_11 {dimension_numbers = #tpu.dot_dimension_numbers<[1], [0], [0], [1], [0, 0, 1, 1], [], []>} : vector<8x128xf32>, vector<128x128xf32>, vector<8x128xf32> -> vector<8x128xf32>
    %c0_i32 = arith.constant 0 : i32
    %22 = arith.cmpi eq, %arg1, %c0_i32 : i32
    %23 = arith.extui %22 : i1 to i32
    %c0_i32_12 = arith.constant 0 : i32
    %24 = arith.cmpi ne, %23, %c0_i32_12 : i32
    scf.if %24 {
      %c0_17 = arith.constant 0 : index
      %c0_18 = arith.constant 0 : index
      %31 = vector.load %arg7[%c0_17, %c0_18] : memref<8x128xf32, #tpu.memory_space<vmem>>, vector<8x128xf32>
      tpu.vector_store %arg7[%c0_17, %c0_18], %21 {strides = array<i32>} : memref<8x128xf32, #tpu.memory_space<vmem>>, vector<8x128xf32>,
    } else {
    }
    %c0_i32_13 = arith.constant 0 : i32
    %25 = arith.cmpi sgt, %arg1, %c0_i32_13 : i32
    %26 = arith.extui %25 : i1 to i32
    %c0_i32_14 = arith.constant 0 : i32
    %27 = arith.cmpi ne, %26, %c0_i32_14 : i32
    scf.if %27 {
      %c0_17 = arith.constant 0 : index
      %c0_18 = arith.constant 0 : index
      %31 = vector.load %arg7[%c0_17, %c0_18] : memref<8x128xf32, #tpu.memory_space<vmem>>, vector<8x128xf32>
      %32 = arith.addf %31, %21 : vector<8x128xf32>
      %c0_19 = arith.constant 0 : index
      %c0_20 = arith.constant 0 : index
      %33 = vector.load %arg7[%c0_19, %c0_20] : memref<8x128xf32, #tpu.memory_space<vmem>>, vector<8x128xf32>
      tpu.vector_store %arg7[%c0_19, %c0_20], %32 {strides = array<i32>} : memref<8x128xf32, #tpu.memory_space<vmem>>, vector<8x128xf32>,
    } else {
    }
    %c0_i32_15 = arith.constant 0 : i32
    %28 = arith.cmpi eq, %arg1, %c0_i32_15 : i32
    %29 = arith.extui %28 : i1 to i32
    %c0_i32_16 = arith.constant 0 : i32
    %30 = arith.cmpi ne, %29, %c0_i32_16 : i32
    scf.if %30 {
      %c0_17 = arith.constant 0 : index
      %c0_18 = arith.constant 0 : index
      %31 = vector.load %arg7[%c0_17, %c0_18] : memref<8x128xf32, #tpu.memory_space<vmem>>, vector<8x128xf32>
      %c0_19 = arith.constant 0 : index
      %c0_20 = arith.constant 0 : index
      %32 = vector.load %arg6[%c0_19, %c0_20] : memref<1x128xf32, #tpu.memory_space<vmem>>, vector<1x128xf32>
      %33 = vector.broadcast %32 : vector<1x128xf32> to vector<8x128xf32>
      %34 = arith.addf %31, %33 : vector<8x128xf32>
      %c0_21 = arith.constant 0 : index
      %c0_22 = arith.constant 0 : index
      %35 = vector.load %arg7[%c0_21, %c0_22] : memref<8x128xf32, #tpu.memory_space<vmem>>, vector<8x128xf32>
      tpu.vector_store %arg7[%c0_21, %c0_22], %34 {strides = array<i32>} : memref<8x128xf32, #tpu.memory_space<vmem>>, vector<8x128xf32>,
    } else {
    }
    return
  }
  func.func @transform_0(%arg0: i32, %arg1: i32) -> (i32, i32) {
    %c0_i32 = arith.constant 0 : i32
    %c0_i32_0 = arith.constant 0 : i32
    return %arg0, %c0_i32 : i32, i32
  }
  func.func @transform_1(%arg0: i32, %arg1: i32) -> (i32, i32) {
    %c0_i32 = arith.constant 0 : i32
    %c0_i32_0 = arith.constant 0 : i32
    return %c0_i32, %arg1 : i32, i32
  }
  func.func @transform_2(%arg0: i32, %arg1: i32) -> (i32, i32) {
    %c0_i32 = arith.constant 0 : i32
    %c0_i32_0 = arith.constant 0 : i32
    return %c0_i32, %arg1 : i32, i32
  }
  func.func @transform_3(%arg0: i32, %arg1: i32) -> (i32, i32) {
    %c0_i32 = arith.constant 0 : i32
    %c0_i32_0 = arith.constant 0 : i32
    return %arg1, %c0_i32 : i32, i32
  }
  func.func @transform_4(%arg0: i32, %arg1: i32) -> (i32, i32) {
    %c0_i32 = arith.constant 0 : i32
    %c0_i32_0 = arith.constant 0 : i32
    %c0_i32_1 = arith.constant 0 : i32
    return %c0_i32, %c0_i32_0 : i32, i32
  }
  func.func @transform_5(%arg0: i32, %arg1: i32) -> (i32, i32) {
    %c0_i32 = arith.constant 0 : i32
    %c0_i32_0 = arith.constant 0 : i32
    return %arg0, %c0_i32 : i32, i32
  }
}

</mosaic_0001>

<bundles_post_ra>
// kernel: tpu_custom_call.1
= control target key start
LH: loop header
LB: loop body
LE: loop exit
PB: predicated region body
PF: predicated region fallthrough
CT: control target
= control target key end

     0   :  { %10 = vsyncpa [#allocation3], 0  ;;  %s1406_s0 = inlined_call_operand.hbm [shape: f32[16,128], index: 0, kind: input, shape index: {}]   ;;  %s1407_s1 = inlined_call_operand.hbm [shape: f32[128,128], index: 1, kind: input, shape index: {}]   ;;  %s1408_s2 = inlined_call_operand.vmem [shape: f32[1,128], index: 2, kind: input, shape index: {}]   ;;  %s1409_s3 = inlined_call_operand.hbm [shape: f32[128,128], index: 3, kind: input, shape index: {}]   ;;  %s1410_s4 = inlined_call_operand.vmem [shape: f32[1,128], index: 4, kind: input, shape index: {}]   ;;  %s1411_s5 = inlined_call_operand.hbm [shape: f32[16,128], index: 5, kind: output, shape index: {}]  }
   0x1   :  { %12 = vsyncpa [#allocation3 + $0x1], 0 }
   0x2   :  { %13 = vsyncpa [#allocation6], 0 }
   0x3   :  { %14 = vsyncpa [#allocation4], 0 }
   0x4   :  { %16 = vsyncpa [#allocation4 + $0x1], 0  ;;  %s1127_s18 = smov 0   ;;  %s1129_s19 = smov 0  }
   0x5   :  { %s1131_s20 = smov 0   ;;  %s1133_s21 = smov 0  }
   0x6   :  { %s1135_s22 = smov 0   ;;  %s1137_s23 = smov 0  }
   0x7 LB: > { %s652_s24 = sadd.s32 4294967295, %s1086_s23   ;;  %s653_s25 = sadd.s32 4294967294, %s1086_s23   ;;  %s1086_s23 = sphi %s1137_s23, %s22_s23   ;;  %s1082_s22 = sphi %s1135_s22, %s1433_s22   ;;  %s1078_s21 = sphi %s1133_s21, %s1432_s21   ;;  %s1074_s20 = sphi %s1131_s20, %s1431_s20   ;;  %s1070_s19 = sphi %s1129_s19, %s1430_s19   ;;  %s1066_s18 = sphi %s1127_s18, %s1429_s18  }
   0x8   : > { %p54_p0 = scmp.ne.s32.totalorder %s1070_s19, %s1066_s18  ;;  %p1161_p1 = scmp.eq.s32.totalorder %s652_s24, 0 }
   0x9   : > { %p1165_p2 = scmp.eq.s32.totalorder %s652_s24, 1  ;;  %p183_p3 = scmp.eq.s32.totalorder %s653_s25, 1 }
   0xa   : > { %s1416_s26 = scalar_select %p1161_p1, 1, 0 }
   0xb   : > { %p1171_p4 = por %p1161_p1, %p54_p0  ;;  %p654_p5 = scmp.ge.s32.totalorder %s1086_s23, 1 }
   0xc   : > { %p1176_p6 = por %p183_p3, %p54_p0  ;;  %p190_p7 = scmp.lt.s32.totalorder %s1086_s23, 3 }
   0xd   : > { %s1418_s28 = scalar_select %p1171_p4, 1, 0 }
   0xe   : > { %s1419_s29 = scalar_select %p1176_p6, 1, 0 }
   0xf   : > { %p1181_p8 = pnand %p654_p5, %p190_p7  ;;  %s1088_s6 = smov [#allocation5]  }
  0x10   : > { %s204_s7 = sshll.u32 %s1088_s6, 4  ;;  %s1089_s9 = smov [#allocation7]   ;;  %s1185_s7 = int_to_ptr.vmem [resolvable:$true] %s204_s7 }
  0x11   : > { %p836_p9 = pneg %p1181_p8  ;;  %s226_s10 = sshll.u32 %s1089_s9, 4  ;;  %s1196_s10 = int_to_ptr.vmem [resolvable:$true] %s226_s10 }
  0x12   : > { %s914_s13 = scalar_lea.hbm %s1407_s1, 2048 }
  0x13   : > { %p1192_p11 = pnand %p836_p9, %p1161_p1  ;;  %p915_p12 = scmp.ne.s32.totalorder %s1407_s1, %s914_s13 }
  0x14   : > { %p921_p5 = scmp.lt.u32.totalorder %s914_s13, %s1407_s1 }
  0x15   : > { %p916_p13 = pneg %p1192_p11 }
  0x17   : > { %p917_p0 = pnand %p916_p13, %p915_p12 }
  0x19   : > { %p918_p3 = pneg %p917_p0 }
  0x1b   : > { %p923_p7 = pnand %p921_p5, %p918_p3 }
  0x1d   : > { %926 = shalt.err (!%p923_p7)
}
  0x1e   : > { %s927_s24 = scalar_lea.vmem %s1185_s7, 2048  ;;  %p935_p1 = scmp.lt.s32.totalorder %s1185_s7, %s1185_s7 }
  0x1f   : > { %p928_p9 = scmp.ne.s32.totalorder %s1185_s7, %s927_s24  ;;  %p936_p12 = scmp.lt.s32.totalorder %s927_s24, %s927_s24 }
  0x21   : > { %p930_p10 = pnand %p928_p9, %p916_p13  ;;  %p937_p0 = por %p936_p12, %p935_p1 }
  0x23   : > { %p931_p6 = pneg %p930_p10 }
  0x25   : > { %p938_p4 = pnand %p937_p0, %p931_p6 }
  0x27   : > { %941 = shalt.err (!%p938_p4)
}
  0x28   : > { %s1090_s25 = smov 128   ;;  %s1091_s6 = smov 8  }
  0x29   : > { %839 = dma.hbm_to_vmem [thread:$0]  (!%p1192_p11), %s1407_s1, 2048, %s1185_s7, [#allocation6], %s1090_s25, %s1090_s25, %s1091_s6  }
  0x2a   : > { %s942_s14 = scalar_lea.hbm %s1409_s3, 2048 }
  0x2b   : > { %p943_p1 = scmp.ne.s32.totalorder %s1409_s3, %s942_s14  ;;  %p949_p10 = scmp.lt.u32.totalorder %s942_s14, %s1409_s3 }
  0x2d   : > { %p945_p4 = pnand %p943_p1, %p916_p13 }
  0x2f   : > { %p946_p6 = pneg %p945_p4 }
  0x31   : > { %p951_p3 = pnand %p949_p10, %p946_p6 }
  0x33   : > { %954 = shalt.err (!%p951_p3)
}
  0x34   : > { %s955_s7 = scalar_lea.vmem %s1196_s10, 2048  ;;  %p963_p12 = scmp.lt.s32.totalorder %s1196_s10, %s1196_s10 }
  0x35   : > { %p956_p5 = scmp.ne.s32.totalorder %s1196_s10, %s955_s7  ;;  %p964_p0 = scmp.lt.s32.totalorder %s955_s7, %s955_s7 }
  0x37   : > { %p958_p7 = pnand %p956_p5, %p916_p13  ;;  %p965_p1 = por %p964_p0, %p963_p12 }
  0x39   : > { %p959_p9 = pneg %p958_p7 }
  0x3b   : > { %p966_p4 = pnand %p965_p1, %p959_p9 }
  0x3d   : > { %969 = shalt.err (!%p966_p4)
}
  0x3e   : > { %842 = dma.hbm_to_vmem [thread:$0]  (!%p1192_p11), %s1409_s3, 2048, %s1196_s10, [#allocation6], %s1090_s25, %s1090_s25, %s1091_s6  }
  0x3f   : > { %s34_s12 = sadd.s32 1, %s1082_s22  ;;  %s41_s13 = sadd.s32 1, %s1074_s20 }
  0x40   : > { %p36_p13 = scmp.ge.s32.totalorder %s34_s12, 2  ;;  %p48_p6 = scmp.ne.s32.totalorder %s1074_s20, %s1070_s19 }
  0x41   : > { %p49_p10 = scmp.eq.s32.totalorder %s1086_s23, 0  ;;  %p853_p3 = scmp.lt.s32.totalorder %s1086_s23, 2 }
  0x42   : > { %s1435_s12 = smov (%p36_p13, %s34_s12), 0  ;;  %p1260_p7 = por %p1165_p2, %p48_p6 }
  0x43   : > { %p50_p5 = por %p49_p10, %p48_p6  ;;  %s38_s14 = ssub.s32 %s1082_s22, %s1435_s12 }
  0x44   : > { %s1422_s8 = scalar_select %p1260_p7, 1, 0 }
  0x45   : > { %s243_s15 = sand.u32 1, %s1074_s20   ;;  %p39_p9 = scmp.eq.s32.totalorder %s38_s14, 0 }
  0x46   : > { %s659_s10 = sshll.u32 %s243_s15, 3  ;;  %s660_s25 = sshll.u32 %s1082_s22, 7 }
  0x47   : > { %s1269_s6 = scalar_select %p39_p9, %s1074_s20, %s41_s13  }
  0x48   : > { %s1274_s24 = scalar_lea.hbm %s1406_s0, %s660_s25  ;;  %s247_s27 = scalar_lea.vmem [#allocation2], %s659_s10 }
  0x49   : > { %s254_s7 = sshll.u32 %s247_s27, 4  ;;  %p1278_p2 = pnand %p853_p3, %p50_p5  ;;  %s1282_s7 = int_to_ptr.vmem [resolvable:$true] %s254_s7 }
  0x4a   : > { %s244_s11 = scalar_lea.sflag [#allocation3], %s243_s15  ;;  %s970_s13 = scalar_lea.hbm %s1274_s24, 128 }
  0x4b   : > { %p971_p11 = scmp.ne.s32.totalorder %s1274_s24, %s970_s13  ;;  %p972_p12 = pneg %p1278_p2 }
  0x4c   : > { %s975_s25 = scalar_lea.hbm %s1406_s0, 256  ;;  %p976_p4 = scmp.lt.u32.totalorder %s1274_s24, %s1406_s0 }
  0x4d   : > { %p973_p0 = pnand %p972_p12, %p971_p11  ;;  %p977_p13 = scmp.lt.u32.totalorder %s975_s25, %s970_s13 }
  0x4e   : > { %p979_p10 = scmp.lt.u32.totalorder %s970_s13, %s1274_s24 }
  0x4f   : > { %p974_p1 = pneg %p973_p0  ;;  %p978_p6 = por %p977_p13, %p976_p4 }
  0x51   : > { %p980_p3 = por %p979_p10, %p978_p6 }
  0x53   : > { %p981_p5 = pnand %p980_p3, %p974_p1 }
  0x55   : > { %984 = shalt.err (!%p981_p5)
}
  0x56   : > { %s985_s15 = scalar_lea.vmem %s1282_s7, 128  ;;  %s1092_s27 = smov [#allocation2]  }
  0x57   : > { %p986_p9 = scmp.ne.s32.totalorder %s1282_s7, %s985_s15  ;;  %s990_s14 = sshll.u32 %s1092_s27, 4  ;;  %s991_s14 = int_to_ptr.vmem [resolvable:$false] %s990_s14 }
  0x58   : > { %s992_s10 = scalar_lea.vmem %s991_s14, 256  ;;  %p993_p7 = scmp.lt.s32.totalorder %s1282_s7, %s991_s14 }
  0x59   : > { %p988_p11 = pnand %p986_p9, %p972_p12  ;;  %p994_p4 = scmp.lt.s32.totalorder %s992_s10, %s985_s15 }
  0x5b   : > { %p989_p0 = pneg %p988_p11  ;;  %p995_p13 = por %p994_p4, %p993_p7 }
  0x5d   : > { %p996_p6 = pnand %p995_p13, %p989_p0 }
  0x5f   : > { %999 = shalt.err (!%p996_p6)
}
  0x60   : > { %846 = dma.hbm_to_vmem [thread:$0]  (!%p1278_p2), %s1274_s24, 128, %s1282_s7, %s244_s11  }
  0x61   : > { %263 = sbr.rel (%p1181_p8) target bundleno = 610 (0x262), region = 40  ;;  %s1312_s13 = sand.u32 (!%p1181_p8), 1, %s1070_s19  }
  0x62   : > { %s662_s25 = sshll.u32 (!%p1181_p8), %s1312_s13, 3  ;;  %s266_s16 = scalar_lea.sflag (!%p1181_p8), [#allocation3], %s1312_s13 }
  0x63   : > { %s1318_s17 = scalar_lea.vmem (!%p1181_p8), [#allocation2], %s662_s25  ;;  %p1424_p7 = scmp.ne.s32.totalorder (!%p1181_p8), %s1418_s28, 0 }
  0x68   : > { %1053 = dma.done.wait (%p1424_p7), %s266_s16, 128  }
  0x69   : > { %1055 = vsyncadd (%p1424_p7), %s266_s16, 4294967168  ;;  %p1425_p2 = scmp.ne.s32.totalorder %s1416_s26, 0 }
  0x6b   : > { %1057 = dma.done.wait (%p1425_p2), [#allocation6], 4096  }
  0x6c   : > { %1059 = vsyncadd (%p1425_p2), [#allocation6], 4294963200  ;;  %v1093_v0 = vmov 0.0|0.0   ;;  %vm1094_vm0 = vmmov 0   ;;  %v1095_v1 = vmov 0.0   ;;  %v312_v2 = vld [vmem:[#allocation5] sm:$0xff] }
  0x6d   : > { %776 = vmatprep.subr.bf16.mxu0 %v1093_v0  ;;  %738 = vmatprep.mubr.msk.f32.mxu0 %vm1094_vm0, %v1095_v1  ;;  %v313_v3 = vld [vmem:[#allocation5 + $0x8] sm:$0xff]  ;;  %v314_v4 = vld [vmem:[#allocation5 + $0x10] sm:$0xff]  ;;  %v315_v6 = vld [vmem:[#allocation5 + $0x18] sm:$0xff]  ;;  %s669_s7 = sshll.u32 %s1078_s21, 7  ;;  %s306_s9 = scalar_lea.vmem [#allocation8], %s662_s25 }
  0x6e   : > { %800 = vmatprep.subr.bf16.mxu1 %v1093_v0  ;;  %773 = vmatprep.mubr.msk.f32.mxu1 %vm1094_vm0, %v1095_v1  ;;  %v777_v5 = vpack.c.bf16 %v313_v3, %v312_v2  ;;  %v780_v7 = vpack.c.bf16 %v315_v6, %v314_v4  ;;  %v316_v8 = vld [vmem:[#allocation5 + $0x20] sm:$0xff]  ;;  %v317_v9 = vld [vmem:[#allocation5 + $0x28] sm:$0xff]  ;;  %v318_v14 = vld [vmem:[#allocation5 + $0x30] sm:$0xff]  ;;  %s539_s11 = sshll.u32 %s306_s9, 4  ;;  %s1357_s14 = scalar_lea.hbm %s1411_s5, %s669_s7  ;;  %s1359_s11 = int_to_ptr.vmem [resolvable:$true] %s539_s11 }
  0x6f   : > { %v414_v10 = vld [vmem:[#allocation7] sm:$0xff]  ;;  %v415_v11 = vld [vmem:[#allocation7 + $0x8] sm:$0xff]  ;;  %v783_v12 = vpack.c.bf16 %v317_v9, %v316_v8  ;;  %v319_v15 = vld [vmem:[#allocation5 + $0x38] sm:$0xff]  ;;  %s526_s10 = scalar_lea.sflag [#allocation4], %s1312_s13  ;;  %s1000_s16 = scalar_lea.vmem %s1359_s11, 128 }
  0x70   : > { %778 = vmatpush3.bf16.msra.mxu0 %v777_v5  ;;  %v801_v13 = vpack.c.bf16 %v415_v11, %v414_v10  ;;  %v786_v16 = vpack.c.bf16 %v319_v15, %v318_v14  ;;  %v320_v17 = vld [vmem:[#allocation5 + $0x40] sm:$0xff]  ;;  %v321_v18 = vld [vmem:[#allocation5 + $0x48] sm:$0xff]  ;;  %v322_v20 = vld [vmem:[#allocation5 + $0x50] sm:$0xff]  ;;  %p1001_p8 = scmp.ne.s32.totalorder %s1359_s11, %s1000_s16  ;;  %p1426_p12 = scmp.ne.s32.totalorder %s1422_s8, 0 }
  0x71   : > { %779 = vmatprep.subr.bf16.mxu0 %v1093_v0  ;;  %v789_v19 = vpack.c.bf16 %v321_v18, %v320_v17  ;;  %v323_v21 = vld [vmem:[#allocation5 + $0x58] sm:$0xff]  ;;  %v324_v23 = vld [vmem:[#allocation5 + $0x60] sm:$0xff]  ;;  %v325_v24 = vld [vmem:[#allocation5 + $0x68] sm:$0xff]  ;;  %s1096_s21 = smov [#allocation8]  }
  0x72   : > { %802 = vmatpush3.bf16.msra.mxu1 %v801_v13  ;;  %v792_v22 = vpack.c.bf16 %v323_v21, %v322_v20  ;;  %v795_v25 = vpack.c.bf16 %v325_v24, %v324_v23  ;;  %v326_v26 = vld [vmem:[#allocation5 + $0x70] sm:$0xff]  ;;  %v327_v27 = vld [vmem:[#allocation5 + $0x78] sm:$0xff]  ;;  %v418_v33 = vld [vmem:[#allocation7 + $0x20] sm:$0xff]  ;;  %p1002_p1 = pnand %p1001_p8, %p1426_p12  ;;  %s1004_s25 = sshll.u32 %s1096_s21, 4  ;;  %s1005_s25 = int_to_ptr.vmem [resolvable:$false] %s1004_s25 }
  0x73   : > { %803 = vmatprep.subr.bf16.mxu1 %v1093_v0  ;;  %v798_v28 = vpack.c.bf16 %v327_v27, %v326_v26  ;;  %v311_v29 = vld [vmem:[%s1318_s17] sm:$0xff]  ;;  %v419_v34 = vld [vmem:[#allocation7 + $0x28] sm:$0xff]  ;;  %v422_v39 = vld [vmem:[#allocation7 + $0x40] sm:$0xff]  ;;  %s1006_s17 = scalar_lea.vmem %s1005_s25, 256  ;;  %p1007_p3 = scmp.lt.s32.totalorder %s1359_s11, %s1005_s25 }
  0x74   : > { %781 = vmatpush3.bf16.msra.mxu0 %v780_v7  ;;  %v416_v30 = vld [vmem:[#allocation7 + $0x10] sm:$0xff]  ;;  %v417_v31 = vld [vmem:[#allocation7 + $0x18] sm:$0xff]  ;;  %v807_v35 = vpack.c.bf16 %v419_v34, %v418_v33  ;;  %v423_v40 = vld [vmem:[#allocation7 + $0x48] sm:$0xff]  ;;  %p1003_p10 = pneg %p1002_p1  ;;  %p1008_p5 = scmp.lt.s32.totalorder %s1006_s17, %s1000_s16 }
  0x75   : > { %782 = vmatprep.subr.bf16.mxu0 %v1093_v0  ;;  %v804_v32 = vpack.c.bf16 %v417_v31, %v416_v30  ;;  %v420_v36 = vld [vmem:[#allocation7 + $0x30] sm:$0xff]  ;;  %v421_v37 = vld [vmem:[#allocation7 + $0x38] sm:$0xff]  ;;  %v813_v41 = vpack.c.bf16 %v423_v40, %v422_v39  ;;  %v426_v45 = vld [vmem:[#allocation7 + $0x60] sm:$0xff] }
  0x76   : > { %v810_v38 = vpack.c.bf16 %v421_v37, %v420_v36  ;;  %v424_v42 = vld [vmem:[#allocation7 + $0x50] sm:$0xff]  ;;  %v425_v43 = vld [vmem:[#allocation7 + $0x58] sm:$0xff]  ;;  %v427_v46 = vld [vmem:[#allocation7 + $0x68] sm:$0xff]  ;;  %p1009_p9 = por %p1008_p5, %p1007_p3 }
  0x77   : > { %805 = vmatpush3.bf16.msra.mxu1 %v804_v32  ;;  %v816_v44 = vpack.c.bf16 %v425_v43, %v424_v42  ;;  %v819_v47 = vpack.c.bf16 %v427_v46, %v426_v45  ;;  %v428_v48 = vld [vmem:[#allocation7 + $0x70] sm:$0xff]  ;;  %v429_v49 = vld [vmem:[#allocation7 + $0x78] sm:$0xff] }
  0x78   : > { %784 = vmatpush3.bf16.msra.mxu0 %v783_v12  ;;  %806 = vmatprep.subr.bf16.mxu1 %v1093_v0  ;;  %v822_v50 = vpack.c.bf16 %v429_v49, %v428_v48  ;;  %v666_v51 = vld [vmem:[%s1408_s2] ss:$0 sm:$0xff]  ;;  %p1010_p11 = pnand %p1009_p9, %p1003_p10 }
  0x79   : > { %785 = vmatprep.subr.bf16.mxu0 %v1093_v0 }
  0x7b   : > { %808 = vmatpush3.bf16.msra.mxu1 %v807_v35 }
  0x7c   : > { %787 = vmatpush3.bf16.msra.mxu0 %v786_v16  ;;  %809 = vmatprep.subr.bf16.mxu1 %v1093_v0 }
  0x7d   : > { %788 = vmatprep.subr.bf16.mxu0 %v1093_v0 }
  0x7f   : > { %811 = vmatpush3.bf16.msra.mxu1 %v810_v38 }
  0x80   : > { %790 = vmatpush3.bf16.msra.mxu0 %v789_v19  ;;  %812 = vmatprep.subr.bf16.mxu1 %v1093_v0 }
  0x81   : > { %791 = vmatprep.subr.bf16.mxu0 %v1093_v0 }
  0x83   : > { %814 = vmatpush3.bf16.msra.mxu1 %v813_v41 }
  0x84   : > { %793 = vmatpush3.bf16.msra.mxu0 %v792_v22  ;;  %815 = vmatprep.subr.bf16.mxu1 %v1093_v0 }
  0x85   : > { %794 = vmatprep.subr.bf16.mxu0 %v1093_v0 }
  0x87   : > { %817 = vmatpush3.bf16.msra.mxu1 %v816_v44 }
  0x88   : > { %796 = vmatpush3.bf16.msra.mxu0 %v795_v25  ;;  %818 = vmatprep.subr.bf16.mxu1 %v1093_v0 }
  0x89   : > { %797 = vmatprep.subr.bf16.mxu0 %v1093_v0 }
  0x8b   : > { %820 = vmatpush3.bf16.msra.mxu1 %v819_v47 }
  0x8c   : > { %799 = vmatpush3.bf16.msra.mxu0 %v798_v28  ;;  %821 = vmatprep.subr.bf16.mxu1 %v1093_v0  ;;  %v667_v0 = vld [vmem:[%s1410_s4] ss:$0 sm:$0xff] }
  0x8f   : > { %739 = vmatmul.mubr.f32.vlgmr.msra.gmra.mrb[0].mxu0 %v311_v29  ;;  %823 = vmatpush3.bf16.msra.mxu1 %v822_v50 }
 0x162   : > { %v401_v52 = vpop.f32.mrb[0].mxu0 }
 0x163   : > { %v402_v53 = vadd.f32 %v666_v51, %v401_v52  ;;  %v740_v54 = vpop.f32.mrb[1].mxu0 }
 0x165   : > { %v406_v55 = vmul.f32 %v402_v53, %v402_v53  ;;  %v405_v61 = vmul.f32 0.5, %v402_v53 }
 0x167   : > { %v407_v56 = vmul.f32 %v406_v55, %v402_v53 }
 0x169   : > { %v408_v57 = vmul.f32 0.044715, %v407_v56 }
 0x16b   : > { %v409_v58 = vadd.f32 %v408_v57, %v402_v53 }
 0x16d   : > { %v410_v59 = vmul.f32 0.7978845, %v409_v58 }
 0x16f   : > { %912 = vtanh.f32 %v410_v59 }
 0x179   : > { %v913_v60 = vpop.eup %912 }
 0x17a   : > { %v412_v62 = vadd.f32 1.0, %v913_v60 }
 0x17c   : > { %v413_v63 = vmul.f32 %v412_v62, %v405_v61 }
 0x17e   : > { %774 = vmatmul.mubr.f32.vlgmr.msra.gmra.mrb[0].mxu1 %v413_v63 }
 0x251   : > { %v496_v1 = vpop.f32.mrb[0].mxu1 }
 0x252   : > { %v523_v2 = vadd.f32 %v667_v0, %v496_v1  ;;  %v775_v3 = vpop.f32.mrb[1].mxu1 }
 0x254   : > { %524 = vst [vmem:[%s306_s9] sm:$0xff] %v523_v2 }
 0x255   : > { %1013 = shalt.err (!%p1010_p11)
}
 0x256   : > { %s1014_s13 = scalar_lea.hbm %s1357_s14, 128  ;;  %s1018_s30 = scalar_lea.hbm %s1411_s5, 256 }
 0x257   : > { %p1015_p0 = scmp.ne.s32.totalorder %s1357_s14, %s1014_s13  ;;  %p1019_p6 = scmp.lt.u32.totalorder %s1357_s14, %s1411_s5 }
 0x258   : > { %p1020_p7 = scmp.lt.u32.totalorder %s1018_s30, %s1014_s13  ;;  %p1022_p8 = scmp.lt.u32.totalorder %s1014_s13, %s1357_s14 }
 0x259   : > { %p1016_p4 = pnand %p1015_p0, %p1426_p12 }
 0x25a   : > { %p1021_p2 = por %p1020_p7, %p1019_p6 }
 0x25b   : > { %p1017_p13 = pneg %p1016_p4 }
 0x25c   : > { %p1023_p1 = por %p1022_p8, %p1021_p2 }
 0x25e   : > { %p1024_p10 = pnand %p1023_p1, %p1017_p13 }
 0x260   : > { %1027 = shalt.err (!%p1024_p10)
}
 0x261   : > { %834 = dma.vmem_to_hbm [thread:$0]  (%p1426_p12), %s1359_s11, 128, %s1357_s14, %s526_s10  }
 0x262 PF: > { %s551_s9 = sand.u32 1, %s1066_s18   ;;  %p1427_p3 = scmp.ne.s32.totalorder %s1419_s29, 0 }
 0x263   : > { %p1428_p5 = scmp.ge.s32.totalorder %s1086_s23, 2  ;;  %s552_s15 = scalar_lea.sflag [#allocation4], %s551_s9 }
 0x265   : > { %p848_p9 = pnand %p1428_p5, %p1427_p3 }
 0x267   : > { %1061 = dma.done.wait (!%p848_p9), %s552_s15, 128  }
 0x268   : > { %1063 = vsyncadd (!%p848_p9), %s552_s15, 4294967168  ;;  %s22_s23 = sadd.s32 1, %s1086_s23   ;;  %s1429_s18 = smov %s1070_s19 }
 0x269   : > { %p19_p11 = scmp.ge.s32.totalorder %s22_s23, 4   ;;  %s1430_s19 = smov %s1074_s20 }
 0x26a   : > { %s1431_s20 = smov %s1269_s6  ;;  %s1432_s21 = smov %s1082_s22 }
 0x26b   : > { %s1433_s22 = smov %s1435_s12  ;;  %21 = sbr.rel (!%p19_p11) target bundleno = 7 (0x7), region = 110 }
 0x272   :  { %557 = vsyncpa [#allocation3], 1 }
 0x273   :  { %559 = vsyncpa [#allocation3 + $0x1], 1 }
 0x274   :  { %560 = vsyncpa [#allocation6], 1 }
 0x275   :  { %561 = vsyncpa [#allocation4], 1 }
 0x276   :  { %563 = vsyncpa [#allocation4 + $0x1], 1 }

</bundles_post_ra>
